<compile_context>
chip_gen: v5e
topology: v5e:2x2
jax: 0.10.0
libtpu: 0.0.40
codegen_flags: <defaults>
</compile_context>

<pallas_src>
import jax
import jax.numpy as jnp
from jax.experimental import pallas as pl
from jax.experimental.pallas import tpu as pltpu

OUT_PAD = 8  # final-layer output columns padded to 8 (sublane-friendly, tiny writeback)


def _round_up(v, m):
    return -(-v // m) * m


def _mlp_kernel(x_ref, w1_ref, b1_ref, w2_ref, b2_ref, w3_ref, b3_ref, o_ref):
    # Layer 1: Linear + ReLU (f32 matmul; MXU slack is free in this HBM-bound kernel)
    h1 = jnp.dot(x_ref[...], w1_ref[...], preferred_element_type=jnp.float32)
    h1 = jnp.maximum(h1 + b1_ref[...], 0.0)
    # Layer 2: Linear + ReLU
    h2 = jnp.dot(h1, w2_ref[...], preferred_element_type=jnp.float32)
    h2 = jnp.maximum(h2 + b2_ref[...], 0.0)
    # Layer 3: Linear (output columns zero-padded to OUT_PAD -> tiny (tb, 8) f32 store)
    out = jnp.dot(h2, w3_ref[...], preferred_element_type=jnp.float32)
    o_ref[...] = (out + b3_ref[...]).astype(o_ref.dtype)


def prepare_params(params):
    """One-time prep: pad the final layer's output columns to OUT_PAD (done once, not per call)."""
    out_dim = params["w3"].shape[1]
    pad = OUT_PAD - out_dim
    return {
        "w1": params["w1"], "b1": params["b1"],
        "w2": params["w2"], "b2": params["b2"],
        "w3p": jnp.pad(params["w3"], ((0, 0), (0, pad))),
        "b3p": jnp.pad(params["b3"], ((0, 0), (0, pad))),
        "out_dim": out_dim,
    }


def regression_head(x, prepared, *, tb=1024):
    """x: [batch, input_dim] float32.  prepared: output of prepare_params()."""
    w1, b1 = prepared["w1"], prepared["b1"]
    w2, b2 = prepared["w2"], prepared["b2"]
    w3p, b3p = prepared["w3p"], prepared["b3p"]
    out_dim = prepared["out_dim"]

    batch, input_dim = x.shape

    # Tile sizing:
    #  - never larger than the (sublane-rounded-up) batch,
    #  - on large batches make sure n_tiles >= 2 so both v7x TensorCores get work.
    tb = min(tb, _round_up(batch, 8))
    if batch >= 16 and tb >= batch:
        tb = _round_up(-(-batch // 2), 8)
    tb = max(tb, 8)
    n_tiles = pl.cdiv(batch, tb)  # ragged last tile handled by the grid (no wrapper pad)

    # Full-array (VMEM-resident) blocks for weights/biases, constant index_map.
    resident = lambda a: pl.BlockSpec(a.shape, lambda i: (0,) * a.ndim)

    out = pl.pallas_call(
        _mlp_kernel,
        out_shape=jax.ShapeDtypeStruct((batch, OUT_PAD), jnp.float32),
        grid=(n_tiles,),
        in_specs=[
            pl.BlockSpec((tb, input_dim), lambda i: (i, 0)),  # x tiles over batch
            resident(w1), resident(b1),
            resident(w2), resident(b2),
            resident(w3p), resident(b3p),
        ],
        out_specs=pl.BlockSpec((tb, OUT_PAD), lambda i: (i, 0)),
        compiler_params=pltpu.CompilerParams(
            dimension_semantics=("parallel",),
        ),
    )(x, w1, b1, w2, b2, w3p, b3p)

    return out[:, :out_dim]


def init_params(key, input_dim=64, hidden_dim=128, output_dim=2):
    """Deterministic init mimicking nn.Linear default (uniform +-1/sqrt(fan_in))."""
    dims = [(input_dim, hidden_dim),
            (hidden_dim, hidden_dim // 2),
            (hidden_dim // 2, output_dim)]
    params = {}
    keys = jax.random.split(key, 2 * len(dims))
    for i, (fan_in, fan_out) in enumerate(dims):
        bound = 1.0 / jnp.sqrt(fan_in)
        w = jax.random.uniform(keys[2 * i], (fan_in, fan_out), jnp.float32, -bound, bound)
        b = jax.random.uniform(keys[2 * i + 1], (1, fan_out), jnp.float32, -bound, bound)
        params[f"w{i + 1}"] = w
        params[f"b{i + 1}"] = b
    return params


def regression_head_ref(x, params):
    h = jnp.maximum(x @ params["w1"] + params["b1"], 0.0)
    h = jnp.maximum(h @ params["w2"] + params["b2"], 0.0)
    return h @ params["w3"] + params["b3"]


if __name__ == "__main__":
    key = jax.random.PRNGKey(0)
    k_param, k_x = jax.random.split(key)

    input_dim, hidden_dim, output_dim = 64, 128, 2
    batch = 8  # small functional test

    params = init_params(k_param, input_dim, hidden_dim, output_dim)
    prepared = prepare_params(params)
    x = jax.random.normal(k_x, (batch, input_dim), jnp.float32)

    out = regression_head(x, prepared)
    out = jax.block_until_ready(out)

    ref = regression_head_ref(x, params)
    assert out.shape == (batch, output_dim)
    # All-f32 matmuls in the kernel -> tight tolerance (reference matmul precision dominates).
    assert jnp.allclose(out, ref, atol=2e-3, rtol=2e-3), (
        float(jnp.max(jnp.abs(out - ref))))

    print("KERNEL_OK")
</pallas_src>

<mosaic_0001>
module attributes {stable_mosaic.version = 11 : i64} {
  func.func @_mlp_kernel(%arg0: i32, %arg1: memref<8x64xf32, #tpu.memory_space<vmem>>, %arg2: memref<64x128xf32, #tpu.memory_space<vmem>>, %arg3: memref<1x128xf32, #tpu.memory_space<vmem>>, %arg4: memref<128x64xf32, #tpu.memory_space<vmem>>, %arg5: memref<1x64xf32, #tpu.memory_space<vmem>>, %arg6: memref<64x8xf32, #tpu.memory_space<vmem>>, %arg7: memref<1x8xf32, #tpu.memory_space<vmem>>, %arg8: memref<8x8xf32, #tpu.memory_space<vmem>>) attributes {dimension_semantics = [#tpu.dimension_semantics<parallel>], iteration_bounds = array<i64: 1>, scalar_prefetch = 0 : i64, scratch_operands = 0 : i64, tpu.core_type = #tpu.core_type<tc>, window_params = [{transform_indices = @transform_0, window_bounds = array<i64: 8, 64>}, {pipeline_mode = #tpu.pipeline_mode<synchronous>, transform_indices = @transform_1, window_bounds = array<i64: 64, 128>}, {pipeline_mode = #tpu.pipeline_mode<synchronous>, transform_indices = @transform_2, window_bounds = array<i64: 1, 128>}, {pipeline_mode = #tpu.pipeline_mode<synchronous>, transform_indices = @transform_3, window_bounds = array<i64: 128, 64>}, {pipeline_mode = #tpu.pipeline_mode<synchronous>, transform_indices = @transform_4, window_bounds = array<i64: 1, 64>}, {pipeline_mode = #tpu.pipeline_mode<synchronous>, transform_indices = @transform_5, window_bounds = array<i64: 64, 8>}, {pipeline_mode = #tpu.pipeline_mode<synchronous>, transform_indices = @transform_6, window_bounds = array<i64: 1, 8>}, {transform_indices = @transform_7, window_bounds = array<i64: 8, 8>}]} {
    %c0 = arith.constant 0 : index
    %c0_0 = arith.constant 0 : index
    %0 = vector.load %arg1[%c0, %c0_0] : memref<8x64xf32, #tpu.memory_space<vmem>>, vector<8x64xf32>
    %c0_1 = arith.constant 0 : index
    %c0_2 = arith.constant 0 : index
    %1 = vector.load %arg2[%c0_1, %c0_2] : memref<64x128xf32, #tpu.memory_space<vmem>>, vector<64x128xf32>
    %cst = arith.constant dense<0.000000e+00> : vector<8x128xf32>
    %2 = tpu.matmul %0, %1, %cst {dimension_numbers = #tpu.dot_dimension_numbers<[1], [0], [0], [1], [0, 0, 1, 1], [], []>} : vector<8x64xf32>, vector<64x128xf32>, vector<8x128xf32> -> vector<8x128xf32>
    %c0_3 = arith.constant 0 : index
    %c0_4 = arith.constant 0 : index
    %3 = vector.load %arg3[%c0_3, %c0_4] : memref<1x128xf32, #tpu.memory_space<vmem>>, vector<1x128xf32>
    %4 = vector.broadcast %3 : vector<1x128xf32> to vector<8x128xf32>
    %5 = arith.addf %2, %4 : vector<8x128xf32>
    %cst_5 = arith.constant 0.000000e+00 : f32
    %6 = vector.broadcast %cst_5 : f32 to vector<8x128xf32>
    %7 = arith.maximumf %5, %6 : vector<8x128xf32>
    %c0_6 = arith.constant 0 : index
    %c0_7 = arith.constant 0 : index
    %8 = vector.load %arg4[%c0_6, %c0_7] : memref<128x64xf32, #tpu.memory_space<vmem>>, vector<128x64xf32>
    %cst_8 = arith.constant dense<0.000000e+00> : vector<8x64xf32>
    %9 = tpu.matmul %7, %8, %cst_8 {dimension_numbers = #tpu.dot_dimension_numbers<[1], [0], [0], [1], [0, 0, 1, 1], [], []>} : vector<8x128xf32>, vector<128x64xf32>, vector<8x64xf32> -> vector<8x64xf32>
    %c0_9 = arith.constant 0 : index
    %c0_10 = arith.constant 0 : index
    %10 = vector.load %arg5[%c0_9, %c0_10] : memref<1x64xf32, #tpu.memory_space<vmem>>, vector<1x64xf32>
    %11 = vector.broadcast %10 : vector<1x64xf32> to vector<8x64xf32>
    %12 = arith.addf %9, %11 : vector<8x64xf32>
    %cst_11 = arith.constant 0.000000e+00 : f32
    %13 = vector.broadcast %cst_11 : f32 to vector<8x64xf32>
    %14 = arith.maximumf %12, %13 : vector<8x64xf32>
    %c0_12 = arith.constant 0 : index
    %c0_13 = arith.constant 0 : index
    %15 = vector.load %arg6[%c0_12, %c0_13] : memref<64x8xf32, #tpu.memory_space<vmem>>, vector<64x8xf32>
    %cst_14 = arith.constant dense<0.000000e+00> : vector<8x8xf32>
    %16 = tpu.matmul %14, %15, %cst_14 {dimension_numbers = #tpu.dot_dimension_numbers<[1], [0], [0], [1], [0, 0, 1, 1], [], []>} : vector<8x64xf32>, vector<64x8xf32>, vector<8x8xf32> -> vector<8x8xf32>
    %c0_15 = arith.constant 0 : index
    %c0_16 = arith.constant 0 : index
    %17 = vector.load %arg7[%c0_15, %c0_16] : memref<1x8xf32, #tpu.memory_space<vmem>>, vector<1x8xf32>
    %18 = vector.broadcast %17 : vector<1x8xf32> to vector<8x8xf32>
    %19 = arith.addf %16, %18 : vector<8x8xf32>
    %c0_17 = arith.constant 0 : index
    %c0_18 = arith.constant 0 : index
    %20 = vector.load %arg8[%c0_17, %c0_18] : memref<8x8xf32, #tpu.memory_space<vmem>>, vector<8x8xf32>
    tpu.vector_store %arg8[%c0_17, %c0_18], %19 {strides = array<i32>} : memref<8x8xf32, #tpu.memory_space<vmem>>, vector<8x8xf32>,
    return
  }
  func.func @transform_0(%arg0: i32) -> (i32, i32) {
    %c0_i32 = arith.constant 0 : i32
    %c0_i32_0 = arith.constant 0 : i32
    return %arg0, %c0_i32 : i32, i32
  }
  func.func @transform_1(%arg0: i32) -> (i32, i32) {
    %c0_i32 = arith.constant 0 : i32
    %c0_i32_0 = arith.constant 0 : i32
    %c0_i32_1 = arith.constant 0 : i32
    return %c0_i32, %c0_i32_0 : i32, i32
  }
  func.func @transform_2(%arg0: i32) -> (i32, i32) {
    %c0_i32 = arith.constant 0 : i32
    %c0_i32_0 = arith.constant 0 : i32
    %c0_i32_1 = arith.constant 0 : i32
    return %c0_i32, %c0_i32_0 : i32, i32
  }
  func.func @transform_3(%arg0: i32) -> (i32, i32) {
    %c0_i32 = arith.constant 0 : i32
    %c0_i32_0 = arith.constant 0 : i32
    %c0_i32_1 = arith.constant 0 : i32
    return %c0_i32, %c0_i32_0 : i32, i32
  }
  func.func @transform_4(%arg0: i32) -> (i32, i32) {
    %c0_i32 = arith.constant 0 : i32
    %c0_i32_0 = arith.constant 0 : i32
    %c0_i32_1 = arith.constant 0 : i32
    return %c0_i32, %c0_i32_0 : i32, i32
  }
  func.func @transform_5(%arg0: i32) -> (i32, i32) {
    %c0_i32 = arith.constant 0 : i32
    %c0_i32_0 = arith.constant 0 : i32
    %c0_i32_1 = arith.constant 0 : i32
    return %c0_i32, %c0_i32_0 : i32, i32
  }
  func.func @transform_6(%arg0: i32) -> (i32, i32) {
    %c0_i32 = arith.constant 0 : i32
    %c0_i32_0 = arith.constant 0 : i32
    %c0_i32_1 = arith.constant 0 : i32
    return %c0_i32, %c0_i32_0 : i32, i32
  }
  func.func @transform_7(%arg0: i32) -> (i32, i32) {
    %c0_i32 = arith.constant 0 : i32
    %c0_i32_0 = arith.constant 0 : i32
    return %arg0, %c0_i32 : i32, i32
  }
}

</mosaic_0001>

<bundles_post_ra>
// kernel: tpu_custom_call.1
= control target key start
LH: loop header
LB: loop body
LE: loop exit
PB: predicated region body
PF: predicated region fallthrough
CT: control target
= control target key end

     0   :  { %s345_s0 = inlined_call_operand.vmem [shape: f32[8,64], index: 0, kind: input, shape index: {}]   ;;  %s346_s1 = inlined_call_operand.vmem [shape: f32[64,128], index: 1, kind: input, shape index: {}]   ;;  %s347_s2 = inlined_call_operand.vmem [shape: f32[1,128], index: 2, kind: input, shape index: {}]   ;;  %s348_s3 = inlined_call_operand.vmem [shape: f32[128,64], index: 3, kind: input, shape index: {}]   ;;  %s349_s4 = inlined_call_operand.vmem [shape: f32[1,64], index: 4, kind: input, shape index: {}]   ;;  %s350_s5 = inlined_call_operand.vmem [shape: f32[64,8], index: 5, kind: input, shape index: {}]   ;;  %s351_s6 = inlined_call_operand.vmem [shape: f32[1,8], index: 6, kind: input, shape index: {}]   ;;  %s352_s7 = inlined_call_operand.hbm [shape: f32[8,8], index: 7, kind: output, shape index: {}]  }
   0x1   :  { %v35_v0 = vld [vmem:[%s346_s1 + $0x38] sm:$0xff]  ;;  %v34_v1 = vld [vmem:[%s346_s1 + $0x30] sm:$0xff]  ;;  %v33_v2 = vld [vmem:[%s346_s1 + $0x28] sm:$0xff] }
   0x2   :  { %52 = vmatpush.msra.mxu0 %v35_v0  ;;  %v80_v3 = vld [vmem:[%s348_s3 + $0x78] sm:$0xff]  ;;  %v79_v4 = vld [vmem:[%s348_s3 + $0x70] sm:$0xff]  ;;  %v32_v5 = vld [vmem:[%s346_s1 + $0x20] sm:$0xff] }
   0x3   :  { %85 = vmatpush.msra.mxu1 %v80_v3  ;;  %v78_v6 = vld [vmem:[%s348_s3 + $0x68] sm:$0xff]  ;;  %v31_v7 = vld [vmem:[%s346_s1 + $0x18] sm:$0xff]  ;;  %v30_v8 = vld [vmem:[%s346_s1 + $0x10] sm:$0xff] }
   0x4   :  { %53 = vmatpush.msra.mxu0 %v34_v1  ;;  %v77_v9 = vld [vmem:[%s348_s3 + $0x60] sm:$0xff] }
   0x5   :  { %86 = vmatpush.msra.mxu1 %v79_v4 }
   0x6   :  { %54 = vmatpush.msra.mxu0 %v33_v2 }
   0x7   :  { %87 = vmatpush.msra.mxu1 %v78_v6 }
   0x8   :  { %55 = vmatpush.msra.mxu0 %v32_v5 }
   0x9   :  { %12 = vsyncpa [#allocation3], 0  ;;  %v76_v10 = vld [vmem:[%s348_s3 + $0x58] sm:$0xff]  ;;  %v29_v11 = vld [vmem:[%s346_s1 + $0x8] sm:$0xff]  ;;  %88 = vmatpush.msra.mxu1 %v77_v9  ;;  %vm40_vm0 = vcmask 523264   ;;  %s191_s21 = smov [#allocation2]  }
   0xa   :  { %56 = vmatpush.msra.mxu0 %v31_v7  ;;  %v75_v12 = vld [vmem:[%s348_s3 + $0x50] sm:$0xff]  ;;  %v28_v13 = vld [vmem:[%s346_s1] sm:$0xff]  ;;  %v74_v15 = vld [vmem:[%s348_s3 + $0x48] sm:$0xff]  ;;  %s148_s22 = sshll.u32 %s191_s21, 4  ;;  %vm141_vm1 = vcmask 64512   ;;  %s149_s22 = int_to_ptr.vmem [resolvable:$true] %s148_s22 }
   0xb   :  { %89 = vmatpush.msra.mxu1 %v76_v10  ;;  %v27_v14 = vld [vmem:[%s345_s0] sm:$0xff]  ;;  %v72_v17 = vld [vmem:[%s348_s3 + $0x38] sm:$0xff]  ;;  %v71_v18 = vld [vmem:[%s348_s3 + $0x30] sm:$0xff] }
   0xc   :  { %57 = vmatpush.msra.mxu0 %v30_v8  ;;  %v73_v16 = vld [vmem:[%s348_s3 + $0x40] sm:$0xff]  ;;  %v70_v19 = vld [vmem:[%s348_s3 + $0x28] sm:$0xff]  ;;  %v68_v21 = vld [vmem:[%s348_s3 + $0x18] sm:$0xff] }
   0xd   :  { %90 = vmatpush.msra.mxu1 %v75_v12  ;;  %v69_v20 = vld [vmem:[%s348_s3 + $0x20] sm:$0xff]  ;;  %v67_v22 = vld [vmem:[%s348_s3 + $0x10] sm:$0xff]  ;;  %v66_v23 = vld [vmem:[%s348_s3 + $0x8] sm:$0xff] }
   0xe   :  { %58 = vmatpush.msra.mxu0 %v29_v11  ;;  %v65_v24 = vld [vmem:[%s348_s3] sm:$0xff]  ;;  %v113_v25 = vld [vmem:[%s350_s5 + $0x38] sm:$0xff]  ;;  %v112_v26 = vld [vmem:[%s350_s5 + $0x30] sm:$0xff] }
   0xf   :  { %91 = vmatpush.msra.mxu1 %v74_v15  ;;  %129 = vmatpush.msra.mxu2 %v113_v25  ;;  %v111_v27 = vld [vmem:[%s350_s5 + $0x28] sm:$0xff]  ;;  %v110_v28 = vld [vmem:[%s350_s5 + $0x20] sm:$0xff]  ;;  %v109_v29 = vld [vmem:[%s350_s5 + $0x18] sm:$0xff] }
  0x10   :  { %59 = vmatpush.msra.mxu0 %v28_v13  ;;  %v162_v30 = vld [vmem:[%s347_s2] ss:$0 sm:$0xff]  ;;  %v108_v34 = vld [vmem:[%s350_s5 + $0x10] sm:$0xff]  ;;  %v107_v35 = vld [vmem:[%s350_s5 + $0x8] sm:$0xff] }
  0x11   :  { %159 = vmatmul.msk.f32.vlgmr.msra.gmra.mxu0 %vm40_vm0, %v27_v14  ;;  %92 = vmatpush.msra.mxu1 %v73_v16  ;;  %v106_v36 = vld [vmem:[%s350_s5] sm:$0xff]  ;;  %s150_s5 = sshll.u32 %s352_s7, 4  ;;  %s151_s5 = int_to_ptr.hbm [resolvable:$true] %s150_s5 }
  0x12   :  { %130 = vmatpush.msra.mxu2 %v112_v26  ;;  %v163_v37 = vld [vmem:[%s349_s4] ss:$0 sm:$0xff] }
  0x13   :  { %93 = vmatpush.msra.mxu1 %v72_v17  ;;  %v164_v41 = vld [vmem:[%s351_s6] ss:$0 sm:$0xff] }
  0x14   :  { %131 = vmatpush.msra.mxu2 %v111_v27 }
  0x15   :  { %94 = vmatpush.msra.mxu1 %v71_v18 }
  0x16   :  { %132 = vmatpush.msra.mxu2 %v110_v28 }
  0x17   :  { %95 = vmatpush.msra.mxu1 %v70_v19 }
  0x18   :  { %133 = vmatpush.msra.mxu2 %v109_v29 }
  0x19   :  { %96 = vmatpush.msra.mxu1 %v69_v20 }
  0x1a   :  { %134 = vmatpush.msra.mxu2 %v108_v34 }
  0x1b   :  { %97 = vmatpush.msra.mxu1 %v68_v21 }
  0x1c   :  { %135 = vmatpush.msra.mxu2 %v107_v35 }
  0x1d   :  { %98 = vmatpush.msra.mxu1 %v67_v22 }
  0x1e   :  { %136 = vmatpush.msra.mxu2 %v106_v36 }
  0x1f   :  { %99 = vmatpush.msra.mxu1 %v66_v23 }
  0x21   :  { %100 = vmatpush.msra.mxu1 %v65_v24 }
  0x8e   :  { %v61_v31 = vpop.f32.mrf.mxu0 }
  0x8f   :  { %v62_v32 = vadd.f32 %v162_v30, %v61_v31 }
  0x91   :  { %v64_v33 = vmax.f32 %v62_v32, 0.0 }
  0x93   :  { %101 = vmatmul.f32.vlgmr.msra.gmra.mxu1 %v64_v33 }
 0x110   :  { %v102_v38 = vpop.f32.mrf.mxu1 }
 0x111   :  { %v103_v39 = vadd.f32 %v163_v37, %v102_v38 }
 0x113   :  { %v105_v40 = vmax.f32 %v103_v39, 0.0 }
 0x115   :  { %160 = vmatmul.msk.f32.vlgmr.msra.gmra.mxu2 %vm40_vm0, %v105_v40 }
 0x198   :  { %v138_v42 = vpop.f32.mrf.mxu2 }
 0x199   :  { %v139_v43 = vadd.f32 %v164_v41, %v138_v42 }
 0x19b   :  { %142 = vst.msk [vmem:[#allocation2] sm:$0xff] %vm141_vm1, %v139_v43 }
 0x19c   :  { %153 = dma.vmem_to_hbm [thread:$0]  %s149_s22, 128, %s151_s5, [#allocation3]  }
 0x19d   :  { %189 = dma.done.wait [#allocation3], 128  }
 0x19e   :  { %190 = vsyncadd [#allocation3], 4294967168 }
 0x19f   :  { %158 = vsyncpa [#allocation3], 1 }

</bundles_post_ra>
